<compile_context>
chip_gen: v6e
topology: v6e:2x2x1
jax: 0.10.0
libtpu: 0.0.40
codegen_flags: <defaults>
</compile_context>

<pallas_src>
import functools
import math

import jax
import jax.numpy as jnp
from jax.experimental import pallas as pl
from jax.experimental.pallas import tpu as pltpu


def _round_up(x, m):
    return (x + m - 1) // m * m


def _ffn_kernel(x_ref, w1_ref, b1_ref, w2_ref, b2_ref, o_ref):
    # x_ref: (TM, H)   w1_ref: (H, MIDp)   b1_ref: (1, MIDp)
    # w2_ref: (MIDp, OUTp)   b2_ref: (1, OUTp)   o_ref: (TM, OUTp)
    x = x_ref[...]
    h = jnp.dot(x, w1_ref[...], preferred_element_type=jnp.float32) + b1_ref[...]
    h = jnp.maximum(h, 0.0)                                   # ReLU epilogue of matmul 1
    out = jnp.dot(h.astype(w2_ref.dtype), w2_ref[...],
                  preferred_element_type=jnp.float32) + b2_ref[...]
    o_ref[...] = out.astype(o_ref.dtype)


def pack_ffn_params(w1, b1, w2, b2):
    """Pack PyTorch-layout params once, outside the jitted hot path.

    w1: (MID, H), b1: (MID,), w2: (OUT, MID), b2: (OUT,).
    Returns (w1t, b1p, w2t, b2p, out_size): transposed to row-major matmul
    layout with the MID and OUT axes zero-padded to multiples of 128.
    """
    mid, _ = w1.shape
    out_size = w2.shape[0]
    mid_p = _round_up(mid, 128)
    out_p = _round_up(out_size, 128)
    w1t = jnp.zeros((w1.shape[1], mid_p), w1.dtype).at[:, :mid].set(w1.T)
    b1p = jnp.zeros((1, mid_p), b1.dtype).at[:, :mid].set(b1)
    w2t = jnp.zeros((mid_p, out_p), w2.dtype).at[:mid, :out_size].set(w2.T)
    b2p = jnp.zeros((1, out_p), b2.dtype).at[:, :out_size].set(b2)
    return w1t, b1p, w2t, b2p, out_size


@functools.partial(jax.jit, static_argnames=("out_size", "block_rows"))
def feed_forward(x, w1t, b1p, w2t, b2p, *, out_size, block_rows=256):
    """x: (..., H); packed params from pack_ffn_params; returns (..., out_size)."""
    *lead, in_size = x.shape
    n_rows = 1
    for d in lead:
        n_rows *= d
    x2d = x.reshape(n_rows, in_size)

    mid_p = w1t.shape[1]
    out_p = w2t.shape[1]

    # Row tile: multiple of 8, never the full row count -> grid length >= 2 so
    # pipelining and v7x megacore sharding actually engage.
    tm = min(block_rows, max(8, _round_up(pl.cdiv(n_rows, 2), 8)))
    n_pad = _round_up(n_rows, tm)
    if n_pad != n_rows:
        x2d = jnp.pad(x2d, ((0, n_pad - n_rows), (0, 0)))
    grid = (n_pad // tm,)

    # VMEM budget: double-buffered x/out tiles + (double-buffered) resident
    # weights + headroom for the f32 intermediate.  Capped for v7x (64 MiB).
    x_bytes = x2d.dtype.itemsize
    w_bytes = w1t.dtype.itemsize
    weight_bytes = (w1t.size + b1p.size + w2t.size + b2p.size) * w_bytes
    tile_bytes = tm * (in_size + out_p) * x_bytes + tm * mid_p * 4
    vmem_needed = 2 * tile_bytes + 2 * weight_bytes
    vmem_limit = int(min(max(4 * vmem_needed, 32 * 1024 * 1024),
                         56 * 1024 * 1024))

    flops = 2 * n_pad * in_size * mid_p + 2 * n_pad * mid_p * out_p
    bytes_accessed = (n_pad * (in_size + out_p)) * x_bytes + weight_bytes
    cost = pl.CostEstimate(flops=int(flops), transcendentals=0,
                           bytes_accessed=int(bytes_accessed))

    # NOTE: for very large H (multi-thousand) add a K/O grid axis (P3 pattern)
    # instead of keeping both full weights resident, especially on v7x.
    out2d = pl.pallas_call(
        _ffn_kernel,
        out_shape=jax.ShapeDtypeStruct((n_pad, out_p), x.dtype),
        grid_spec=pltpu.PrefetchScalarGridSpec(
            num_scalar_prefetch=0,
            grid=grid,
            in_specs=[
                pl.BlockSpec((tm, in_size), lambda i: (i, 0)),      # x row tile
                pl.BlockSpec((in_size, mid_p), lambda i: (0, 0)),   # W1 (resident)
                pl.BlockSpec((1, mid_p), lambda i: (0, 0)),         # b1
                pl.BlockSpec((mid_p, out_p), lambda i: (0, 0)),     # W2 (resident)
                pl.BlockSpec((1, out_p), lambda i: (0, 0)),         # b2
            ],
            out_specs=pl.BlockSpec((tm, out_p), lambda i: (i, 0)),
        ),
        compiler_params=pltpu.CompilerParams(
            dimension_semantics=("parallel",),
            vmem_limit_bytes=vmem_limit,
        ),
        cost_estimate=cost,
    )(x2d, w1t, b1p, w2t, b2p)

    out2d = out2d[:n_rows, :out_size]
    return out2d.reshape(*lead, out_size)


def _reference(x, w1, b1, w2, b2):
    h = jnp.maximum(jnp.einsum("...i,mi->...m", x, w1) + b1, 0.0)
    return jnp.einsum("...m,om->...o", h, w2) + b2


if __name__ == "__main__":
    key = jax.random.PRNGKey(0)
    k_x, k_w1, k_b1, k_w2, k_b2 = jax.random.split(key, 5)

    batch, seq = 2, 8
    hsize = 32                      # __C.HSIZE
    mid_size = 4 * hsize            # MID_SIZE = HSIZE * 4

    x = jax.random.normal(k_x, (batch, seq, hsize), dtype=jnp.float32)

    # nn.Linear-style init: U(-1/sqrt(fan_in), +1/sqrt(fan_in)).
    bound1 = 1.0 / math.sqrt(hsize)
    bound2 = 1.0 / math.sqrt(mid_size)
    w1 = jax.random.uniform(k_w1, (mid_size, hsize), jnp.float32, -bound1, bound1)
    b1 = jax.random.uniform(k_b1, (mid_size,), jnp.float32, -bound1, bound1)
    w2 = jax.random.uniform(k_w2, (hsize, mid_size), jnp.float32, -bound2, bound2)
    b2 = jax.random.uniform(k_b2, (hsize,), jnp.float32, -bound2, bound2)

    # Pre-pack weights once (outside the jitted hot path).
    w1t, b1p, w2t, b2p, out_size = pack_ffn_params(w1, b1, w2, b2)

    out = feed_forward(x, w1t, b1p, w2t, b2p, out_size=out_size)
    jax.block_until_ready(out)

    ref = _reference(x, w1, b1, w2, b2)
    assert out.shape == (batch, seq, hsize)
    err = float(jnp.max(jnp.abs(out - ref)))
    assert jnp.allclose(out, ref, atol=1e-4, rtol=1e-4), f"mismatch vs reference: {err}"

    print("KERNEL_OK")
</pallas_src>

<mosaic_0001>
module attributes {stable_mosaic.version = 11 : i64} {
  func.func @_ffn_kernel(%arg0: i32, %arg1: memref<8x32xf32, #tpu.memory_space<vmem>>, %arg2: memref<32x128xf32, #tpu.memory_space<vmem>>, %arg3: memref<1x128xf32, #tpu.memory_space<vmem>>, %arg4: memref<128x128xf32, #tpu.memory_space<vmem>>, %arg5: memref<1x128xf32, #tpu.memory_space<vmem>>, %arg6: memref<8x128xf32, #tpu.memory_space<vmem>>) attributes {dimension_semantics = [#tpu.dimension_semantics<parallel>], iteration_bounds = array<i64: 2>, scalar_prefetch = 0 : i64, scratch_operands = 0 : i64, tpu.core_type = #tpu.core_type<tc>, window_params = [{transform_indices = @transform_0, window_bounds = array<i64: 8, 32>}, {pipeline_mode = #tpu.pipeline_mode<synchronous>, transform_indices = @transform_1, window_bounds = array<i64: 32, 128>}, {pipeline_mode = #tpu.pipeline_mode<synchronous>, transform_indices = @transform_2, window_bounds = array<i64: 1, 128>}, {pipeline_mode = #tpu.pipeline_mode<synchronous>, transform_indices = @transform_3, window_bounds = array<i64: 128, 128>}, {pipeline_mode = #tpu.pipeline_mode<synchronous>, transform_indices = @transform_4, window_bounds = array<i64: 1, 128>}, {transform_indices = @transform_5, window_bounds = array<i64: 8, 128>}]} {
    %c0 = arith.constant 0 : index
    %c0_0 = arith.constant 0 : index
    %0 = vector.load %arg1[%c0, %c0_0] : memref<8x32xf32, #tpu.memory_space<vmem>>, vector<8x32xf32>
    %c0_1 = arith.constant 0 : index
    %c0_2 = arith.constant 0 : index
    %1 = vector.load %arg2[%c0_1, %c0_2] : memref<32x128xf32, #tpu.memory_space<vmem>>, vector<32x128xf32>
    %cst = arith.constant dense<0.000000e+00> : vector<8x128xf32>
    %2 = tpu.matmul %0, %1, %cst {dimension_numbers = #tpu.dot_dimension_numbers<[1], [0], [0], [1], [0, 0, 1, 1], [], []>} : vector<8x32xf32>, vector<32x128xf32>, vector<8x128xf32> -> vector<8x128xf32>
    %c0_3 = arith.constant 0 : index
    %c0_4 = arith.constant 0 : index
    %3 = vector.load %arg3[%c0_3, %c0_4] : memref<1x128xf32, #tpu.memory_space<vmem>>, vector<1x128xf32>
    %4 = vector.broadcast %3 : vector<1x128xf32> to vector<8x128xf32>
    %5 = arith.addf %2, %4 : vector<8x128xf32>
    %cst_5 = arith.constant 0.000000e+00 : f32
    %6 = vector.broadcast %cst_5 : f32 to vector<8x128xf32>
    %7 = arith.maximumf %5, %6 : vector<8x128xf32>
    %c0_6 = arith.constant 0 : index
    %c0_7 = arith.constant 0 : index
    %8 = vector.load %arg4[%c0_6, %c0_7] : memref<128x128xf32, #tpu.memory_space<vmem>>, vector<128x128xf32>
    %cst_8 = arith.constant dense<0.000000e+00> : vector<8x128xf32>
    %9 = tpu.matmul %7, %8, %cst_8 {dimension_numbers = #tpu.dot_dimension_numbers<[1], [0], [0], [1], [0, 0, 1, 1], [], []>} : vector<8x128xf32>, vector<128x128xf32>, vector<8x128xf32> -> vector<8x128xf32>
    %c0_9 = arith.constant 0 : index
    %c0_10 = arith.constant 0 : index
    %10 = vector.load %arg5[%c0_9, %c0_10] : memref<1x128xf32, #tpu.memory_space<vmem>>, vector<1x128xf32>
    %11 = vector.broadcast %10 : vector<1x128xf32> to vector<8x128xf32>
    %12 = arith.addf %9, %11 : vector<8x128xf32>
    %c0_11 = arith.constant 0 : index
    %c0_12 = arith.constant 0 : index
    %13 = vector.load %arg6[%c0_11, %c0_12] : memref<8x128xf32, #tpu.memory_space<vmem>>, vector<8x128xf32>
    tpu.vector_store %arg6[%c0_11, %c0_12], %12 {strides = array<i32>} : memref<8x128xf32, #tpu.memory_space<vmem>>, vector<8x128xf32>,
    return
  }
  func.func @transform_0(%arg0: i32) -> (i32, i32) {
    %c0_i32 = arith.constant 0 : i32
    %c0_i32_0 = arith.constant 0 : i32
    return %arg0, %c0_i32 : i32, i32
  }
  func.func @transform_1(%arg0: i32) -> (i32, i32) {
    %c0_i32 = arith.constant 0 : i32
    %c0_i32_0 = arith.constant 0 : i32
    %c0_i32_1 = arith.constant 0 : i32
    return %c0_i32, %c0_i32_0 : i32, i32
  }
  func.func @transform_2(%arg0: i32) -> (i32, i32) {
    %c0_i32 = arith.constant 0 : i32
    %c0_i32_0 = arith.constant 0 : i32
    %c0_i32_1 = arith.constant 0 : i32
    return %c0_i32, %c0_i32_0 : i32, i32
  }
  func.func @transform_3(%arg0: i32) -> (i32, i32) {
    %c0_i32 = arith.constant 0 : i32
    %c0_i32_0 = arith.constant 0 : i32
    %c0_i32_1 = arith.constant 0 : i32
    return %c0_i32, %c0_i32_0 : i32, i32
  }
  func.func @transform_4(%arg0: i32) -> (i32, i32) {
    %c0_i32 = arith.constant 0 : i32
    %c0_i32_0 = arith.constant 0 : i32
    %c0_i32_1 = arith.constant 0 : i32
    return %c0_i32, %c0_i32_0 : i32, i32
  }
  func.func @transform_5(%arg0: i32) -> (i32, i32) {
    %c0_i32 = arith.constant 0 : i32
    %c0_i32_0 = arith.constant 0 : i32
    return %arg0, %c0_i32 : i32, i32
  }
}

</mosaic_0001>

<bundles_post_ra>
// kernel: feed_forward.1
= control target key start
LH: loop header
LB: loop body
LE: loop exit
PB: predicated region body
PF: predicated region fallthrough
CT: control target
= control target key end

     0   :  { %10 = vsyncpa [#allocation3], 0  ;;  %s996_s0 = inlined_call_operand.hbm [shape: f32[16,32], index: 0, kind: input, shape index: {}]   ;;  %s997_s1 = inlined_call_operand.hbm [shape: f32[32,128], index: 1, kind: input, shape index: {}]   ;;  %s998_s2 = inlined_call_operand.vmem [shape: f32[1,128], index: 2, kind: input, shape index: {}]   ;;  %s999_s3 = inlined_call_operand.hbm [shape: f32[128,128], index: 3, kind: input, shape index: {}]   ;;  %s1000_s4 = inlined_call_operand.vmem [shape: f32[1,128], index: 4, kind: input, shape index: {}]   ;;  %s1001_s5 = inlined_call_operand.vmem [shape: f32[16,128], index: 5, kind: output, shape index: {}]  }
   0x1   :  { %12 = vsyncpa [#allocation3 + $0x1], 0 }
   0x2   :  { %13 = vsyncpa [#allocation5], 0  ;;  %s840_s18 = smov 0   ;;  %s842_s19 = smov 0  }
   0x3   :  { %s844_s20 = smov 0   ;;  %s846_s21 = smov 0  }
   0x4 LB: > { %s859_s22 = sadd.s32 4294967295, %s801_s21   ;;  %p39_p0 = scmp.ne.s32.totalorder %s793_s19, %s789_s18  ;;  %s801_s21 = sphi %s846_s21, %s1016_s21   ;;  %s797_s20 = sphi %s844_s20, %s1015_s20   ;;  %s793_s19 = sphi %s842_s19, %s1014_s19   ;;  %s789_s18 = sphi %s840_s18, %s1013_s18  }
   0x5   : > { %p1002_p1 = scmp.eq.s32.totalorder %s859_s22, 0  ;;  %p535_p2 = scmp.ge.s32.totalorder %s801_s21, 1 }
   0x6   : > { %p160_p3 = scmp.lt.s32.totalorder %s801_s21, 3  ;;  %s803_s25 = smov [#allocation4]  }
   0x7   : > { %p867_p4 = por %p1002_p1, %p39_p0  ;;  %s172_s26 = sshll.u32 %s803_s25, 4  ;;  %s173_s26 = int_to_ptr.vmem [resolvable:$true] %s172_s26 }
   0x8   : > { %p871_p5 = pnand %p535_p2, %p160_p3  ;;  %s804_s28 = smov [#allocation6]  }
   0x9   : > { %s1005_s23 = scalar_select %p867_p4, 1, 0 }
   0xa   : > { %s1006_s24 = scalar_select %p871_p5, 1, 0 }
   0xb   : > { %p629_p6 = pneg %p871_p5  ;;  %s188_s29 = sshll.u32 %s804_s28, 4  ;;  %s189_s29 = int_to_ptr.vmem [resolvable:$true] %s188_s29 }
   0xc   : > { %s694_s30 = scalar_lea.vmem %s173_s26, 512  ;;  %p702_p12 = scmp.lt.s32.totalorder %s173_s26, %s173_s26 }
   0xd   : > { %p879_p7 = pnand %p629_p6, %p1002_p1  ;;  %p695_p9 = scmp.ne.s32.totalorder %s173_s26, %s694_s30 }
   0xe   : > { %p703_p13 = scmp.lt.s32.totalorder %s694_s30, %s694_s30 }
   0xf   : > { %p685_p8 = pneg %p879_p7 }
  0x10   : > { %p704_p0 = por %p703_p13, %p702_p12 }
  0x11   : > { %p697_p10 = pnand %p695_p9, %p685_p8 }
  0x13   : > { %p698_p11 = pneg %p697_p10 }
  0x15   : > { %p705_p2 = pnand %p704_p0, %p698_p11 }
  0x17   : > { %708 = shalt.err (!%p705_p2)
}
  0x18   : > { %s805_s6 = smov 128   ;;  %s806_s7 = smov 8  }
  0x19   : > { %632 = dma.hbm_to_vmem [thread:$0]  (!%p879_p7), %s997_s1, 512, %s173_s26, [#allocation5], %s805_s6, %s805_s6, %s806_s7  }
  0x1a   : > { %s720_s10 = scalar_lea.vmem %s189_s29, 2048  ;;  %p728_p10 = scmp.lt.s32.totalorder %s189_s29, %s189_s29 }
  0x1b   : > { %p721_p3 = scmp.ne.s32.totalorder %s189_s29, %s720_s10  ;;  %p729_p1 = scmp.lt.s32.totalorder %s720_s10, %s720_s10 }
  0x1d   : > { %p723_p6 = pnand %p721_p3, %p685_p8  ;;  %p730_p12 = por %p729_p1, %p728_p10 }
  0x1f   : > { %p724_p9 = pneg %p723_p6 }
  0x21   : > { %p731_p11 = pnand %p730_p12, %p724_p9 }
  0x23   : > { %734 = shalt.err (!%p731_p11)
}
  0x24   : > { %635 = dma.hbm_to_vmem [thread:$0]  (!%p879_p7), %s999_s3, 2048, %s189_s29, [#allocation5], %s805_s6, %s805_s6, %s806_s7  }
  0x25   : > { %s902_s13 = sadd.s32 1, %s801_s21   ;;  %s26_s14 = sadd.s32 1, %s797_s20 }
  0x26   : > { %s23_s15 = ssub.s32 %s801_s21, %s902_s13  ;;  %p33_p1 = scmp.ne.s32.totalorder %s797_s20, %s793_s19 }
  0x27   : > { %p24_p8 = scmp.eq.s32.totalorder %s23_s15, 0  ;;  %p34_p13 = scmp.eq.s32.totalorder %s801_s21, 0 }
  0x28   : > { %p642_p0 = scmp.lt.s32.totalorder %s801_s21, 2  ;;  %s205_s16 = sand.u32 1, %s797_s20  }
  0x29   : > { %s913_s17 = scalar_select %p24_p8, %s797_s20, %s26_s14  }
  0x2a   : > { %p35_p2 = por %p34_p13, %p33_p1  ;;  %s539_s18 = sshll.u32 %s205_s16, 3 }
  0x2b   : > { %s540_s25 = sshll.u32 %s801_s21, 7  ;;  %s209_s29 = scalar_lea.vmem [#allocation2], %s539_s18 }
  0x2c   : > { %s919_s28 = scalar_lea.hbm %s996_s0, %s540_s25  ;;  %s216_s30 = sshll.u32 %s209_s29, 4  ;;  %s217_s30 = int_to_ptr.vmem [resolvable:$true] %s216_s30 }
  0x2d   : > { %p921_p7 = pnand %p642_p0, %p35_p2  ;;  %s206_s7 = scalar_lea.sflag [#allocation3], %s205_s16 }
  0x2e   : > { %s735_s8 = scalar_lea.hbm %s919_s28, 128  ;;  %s740_s10 = scalar_lea.hbm %s996_s0, 256 }
  0x2f   : > { %p736_p3 = scmp.ne.s32.totalorder %s919_s28, %s735_s8  ;;  %p737_p6 = pneg %p921_p7 }
  0x30   : > { %p741_p12 = scmp.lt.s32.totalorder %s919_s28, %s996_s0  ;;  %p742_p11 = scmp.lt.s32.totalorder %s740_s10, %s735_s8 }
  0x31   : > { %p738_p9 = pnand %p737_p6, %p736_p3 }
  0x32   : > { %p743_p1 = por %p742_p11, %p741_p12 }
  0x33   : > { %p739_p10 = pneg %p738_p9 }
  0x35   : > { %p744_p8 = pnand %p743_p1, %p739_p10 }
  0x37   : > { %747 = shalt.err (!%p744_p8)
}
  0x38   : > { %s748_s14 = scalar_lea.vmem %s217_s30, 128  ;;  %s807_s15 = smov [#allocation2]  }
  0x39   : > { %p749_p13 = scmp.ne.s32.totalorder %s217_s30, %s748_s14  ;;  %s753_s16 = sshll.u32 %s807_s15, 4  ;;  %s754_s16 = int_to_ptr.vmem [resolvable:$false] %s753_s16 }
  0x3a   : > { %s755_s18 = scalar_lea.vmem %s754_s16, 256  ;;  %p756_p3 = scmp.lt.s32.totalorder %s217_s30, %s754_s16 }
  0x3b   : > { %p751_p0 = pnand %p749_p13, %p737_p6  ;;  %p757_p9 = scmp.lt.s32.totalorder %s755_s18, %s748_s14 }
  0x3d   : > { %p752_p2 = pneg %p751_p0  ;;  %p758_p4 = por %p757_p9, %p756_p3 }
  0x3f   : > { %p759_p5 = pnand %p758_p4, %p752_p2 }
  0x41   : > { %762 = shalt.err (!%p759_p5)
}
  0x42   : > { %639 = dma.hbm_to_vmem [thread:$0]  (!%p921_p7), %s919_s28, 128, %s217_s30, %s206_s7  }
  0x43   : > { %p1009_p10 = scmp.ne.s32.totalorder %s1006_s24, 0 }
  0x44   : > { %s227_s25 = sand.u32 (!%p1009_p10), 1, %s793_s19   ;;  %p1010_p6 = scmp.ne.s32.totalorder (!%p1009_p10), %s1005_s23, 0 }
  0x45   : > { %225 = sbr.rel (%p1009_p10) target bundleno = 481 (0x1e1), region = 40  ;;  %s542_s26 = sshll.u32 (!%p1009_p10), %s227_s25, 3 }
  0x46   : > { %s228_s27 = scalar_lea.sflag (!%p1009_p10), [#allocation3], %s227_s25  ;;  %s231_s29 = scalar_lea.vmem (!%p1009_p10), [#allocation2], %s542_s26 }
  0x4a   : > { %780 = dma.done.wait (%p1010_p6), %s228_s27, 128  }
  0x4b   : > { %782 = vsyncadd (%p1010_p6), %s228_s27, 4294967168  ;;  %p1011_p4 = scmp.eq.s32.totalorder %s859_s22, 0 }
  0x4d   : > { %784 = dma.done.wait (%p1011_p4), [#allocation5], 2560   ;;  %p1012_p5 = pmov %p1011_p4 }
  0x4e   : > { %v808_v0 = vmov 0.0   ;;  %vm809_vm0 = vmmov 0   ;;  %v273_v1 = vld [vmem:[#allocation4 + $0x18] sm:$0xff]  ;;  %v272_v2 = vld [vmem:[#allocation4 + $0x10] sm:$0xff]  ;;  %v271_v4 = vld [vmem:[#allocation4 + $0x8] sm:$0xff]  ;;  %vm281_vm1 = vcmask 261120  }
  0x4f   : > { %786 = vsyncadd (%p1012_p5), [#allocation5], 4294964736  ;;  %573 = vmatprep.subr.mxu0 %v808_v0  ;;  %581 = vmatprep.mubr.msk.f32.mxu0 %vm809_vm0, %v808_v0  ;;  %v371_v3 = vld [vmem:[#allocation6 + $0x78] sm:$0xff]  ;;  %v370_v5 = vld [vmem:[#allocation6 + $0x70] sm:$0xff]  ;;  %p265_p7 = scmp.lt.s32.totalorder %s859_s22, 1 }
  0x50   : > { %584 = vmatprep.subr.mxu1 %v808_v0  ;;  %616 = vmatprep.mubr.msk.f32.mxu1 %vm809_vm0, %v808_v0  ;;  %v369_v6 = vld [vmem:[#allocation6 + $0x68] sm:$0xff]  ;;  %v270_v7 = vld [vmem:[#allocation4] sm:$0xff]  ;;  %v269_v8 = vld [vmem:[%s231_s29] sm:$0xff] }
  0x51   : > { %574 = vmatpush3.msra.mxu0 %v273_v1  ;;  %585 = vmatpush3.msra.mxu1 %v371_v3  ;;  %v368_v9 = vld [vmem:[#allocation6 + $0x60] sm:$0xff]  ;;  %v367_v10 = vld [vmem:[#allocation6 + $0x58] sm:$0xff]  ;;  %v366_v11 = vld [vmem:[#allocation6 + $0x50] sm:$0xff]  ;;  %s1018_s22 = smov (!%p265_p7, %s859_s22), 1 }
  0x52   : > { %575 = vmatprep.subr.mxu0 %v808_v0  ;;  %586 = vmatprep.subr.mxu1 %v808_v0  ;;  %v365_v12 = vld [vmem:[#allocation6 + $0x48] sm:$0xff]  ;;  %v364_v13 = vld [vmem:[#allocation6 + $0x40] sm:$0xff]  ;;  %v363_v14 = vld [vmem:[#allocation6 + $0x38] sm:$0xff]  ;;  %s545_s28 = sshll.u32 %s1018_s22, 3 }
  0x53   : > { %576 = vmatpush3.msra.mxu0 %v272_v2  ;;  %587 = vmatpush3.msra.mxu1 %v370_v5  ;;  %v362_v15 = vld [vmem:[#allocation6 + $0x30] sm:$0xff]  ;;  %v361_v16 = vld [vmem:[#allocation6 + $0x28] sm:$0xff]  ;;  %v360_v17 = vld [vmem:[#allocation6 + $0x20] sm:$0xff]  ;;  %s268_s21 = scalar_lea.vmem %s1001_s5, %s545_s28 }
  0x54   : > { %577 = vmatprep.subr.mxu0 %v808_v0  ;;  %588 = vmatprep.subr.mxu1 %v808_v0  ;;  %v359_v18 = vld [vmem:[#allocation6 + $0x18] sm:$0xff]  ;;  %v358_v19 = vld [vmem:[#allocation6 + $0x10] sm:$0xff]  ;;  %v357_v20 = vld [vmem:[#allocation6 + $0x8] sm:$0xff] }
  0x55   : > { %578 = vmatpush3.msra.mxu0 %v271_v4  ;;  %589 = vmatpush3.msra.mxu1 %v369_v6  ;;  %v356_v21 = vld [vmem:[#allocation6] sm:$0xff]  ;;  %v546_v22 = vld [vmem:[%s998_s2] ss:$0 sm:$0xff] }
  0x56   : > { %579 = vmatprep.subr.mxu0 %v808_v0  ;;  %590 = vmatprep.subr.mxu1 %v808_v0  ;;  %v548_v27 = vld [vmem:[%s1000_s4] ss:$0 sm:$0xff] }
  0x57   : > { %580 = vmatpush3.msra.mxu0 %v270_v7  ;;  %591 = vmatpush3.msra.mxu1 %v368_v9 }
  0x58   : > { %582 = vmatmul.mubr.msk.f32.vlgmr.msra.gmra.mxu0 %vm281_vm1, %v269_v8  ;;  %592 = vmatprep.subr.mxu1 %v808_v0 }
  0x59   : > { %593 = vmatpush3.msra.mxu1 %v367_v10 }
  0x5a   : > { %594 = vmatprep.subr.mxu1 %v808_v0 }
  0x5b   : > { %595 = vmatpush3.msra.mxu1 %v366_v11 }
  0x5c   : > { %596 = vmatprep.subr.mxu1 %v808_v0 }
  0x5d   : > { %597 = vmatpush3.msra.mxu1 %v365_v12 }
  0x5e   : > { %598 = vmatprep.subr.mxu1 %v808_v0 }
  0x5f   : > { %599 = vmatpush3.msra.mxu1 %v364_v13 }
  0x60   : > { %600 = vmatprep.subr.mxu1 %v808_v0 }
  0x61   : > { %601 = vmatpush3.msra.mxu1 %v363_v14 }
  0x62   : > { %602 = vmatprep.subr.mxu1 %v808_v0 }
  0x63   : > { %603 = vmatpush3.msra.mxu1 %v362_v15 }
  0x64   : > { %604 = vmatprep.subr.mxu1 %v808_v0 }
  0x65   : > { %605 = vmatpush3.msra.mxu1 %v361_v16 }
  0x66   : > { %606 = vmatprep.subr.mxu1 %v808_v0 }
  0x67   : > { %607 = vmatpush3.msra.mxu1 %v360_v17 }
  0x68   : > { %608 = vmatprep.subr.mxu1 %v808_v0 }
  0x69   : > { %609 = vmatpush3.msra.mxu1 %v359_v18 }
  0x6a   : > { %610 = vmatprep.subr.mxu1 %v808_v0 }
  0x6b   : > { %611 = vmatpush3.msra.mxu1 %v358_v19 }
  0x6c   : > { %612 = vmatprep.subr.mxu1 %v808_v0 }
  0x6d   : > { %613 = vmatpush3.msra.mxu1 %v357_v20 }
  0x6e   : > { %614 = vmatprep.subr.mxu1 %v808_v0 }
  0x6f   : > { %615 = vmatpush3.msra.mxu1 %v356_v21 }
 0x118   : > { %v351_v23 = vpop.f32.mrf.mxu0 }
 0x119   : > { %v352_v24 = vadd.f32 %v546_v22, %v351_v23 }
 0x11a   : > { %v583_v25 = vpop.f32.mrf.mxu0 }
 0x11b   : > { %v355_v26 = vmax.f32 %v352_v24, 0.0 }
 0x11d   : > { %617 = vmatmul.mubr.f32.vlgmr.msra.gmra.mxu1 %v355_v26 }
 0x1dd   : > { %v445_v28 = vpop.f32.mrf.mxu1 }
 0x1de   : > { %v446_v29 = vadd.f32 %v548_v27, %v445_v28 }
 0x1df   : > { %v618_v30 = vpop.f32.mrf.mxu1 }
 0x1e0   : > { %449 = vst [vmem:[%s268_s21] sm:$0xff] %v446_v29 }
 0x1e1 PF: > { %p16_p12 = scmp.ge.s32.totalorder %s902_s13, 4   ;;  %s1013_s18 = smov %s793_s19 }
 0x1e2   : > { %s1014_s19 = smov %s797_s20  ;;  %s1015_s20 = smov %s913_s17 }
 0x1e3   : > { %s1016_s21 = smov %s902_s13  ;;  %18 = sbr.rel (!%p16_p12) target bundleno = 4 (0x4), region = 88 }
 0x1e8   :  { %469 = vsyncpa [#allocation3], 1 }
 0x1e9   :  { %471 = vsyncpa [#allocation3 + $0x1], 1 }
 0x1ea   :  { %472 = vsyncpa [#allocation5], 1 }

</bundles_post_ra>
